<compile_context>
chip_gen: v6e
topology: v6e:2x2x1
jax: 0.10.0
libtpu: 0.0.40
codegen_flags: <defaults>
</compile_context>

<pallas_src>
import jax
import jax.numpy as jnp
from jax import lax
from jax.experimental import pallas as pl
from jax.experimental.pallas import tpu as pltpu


def _attention_scores_kernel(q_ref, w_ref, k_ref, o_ref, qw_ref):
    # q_ref: (1, tq, Dqp) bf16   w_ref: (Dqp, Dkp) bf16   k_ref: (1, tk, Dkp) bf16
    # o_ref: (1, tq, tk) f32     qw_ref: (tq, Dkp) bf16 scratch (persists over ki)
    @pl.when(pl.program_id(2) == 0)
    def _():
        qw = jnp.dot(q_ref[0], w_ref[...], preferred_element_type=jnp.float32)
        qw_ref[...] = qw.astype(qw_ref.dtype)

    # qw @ keys^T without materializing a transposed copy of keys: contract the
    # last (lane) dim of both operands directly on the MXU.
    scores = lax.dot_general(
        qw_ref[...], k_ref[0],
        dimension_numbers=(((1,), (1,)), ((), ())),
        preferred_element_type=jnp.float32,
    )
    o_ref[0] = scores.astype(o_ref.dtype)


def _round_up(x, m):
    return ((x + m - 1) // m) * m


def _cdiv(a, b):
    return (a + b - 1) // b


def _derive_tile(extent, gran, tile_max):
    """Tile <= tile_max (multiple of gran) and padded extent (multiple of tile),
    minimizing padding (never pads up to a whole max-size tile)."""
    aligned = _round_up(extent, gran)
    if aligned <= tile_max:
        return aligned, aligned
    ntiles = _cdiv(aligned, tile_max)
    tile = _round_up(_cdiv(aligned, ntiles), gran)
    padded = tile * _cdiv(aligned, tile)
    return tile, padded


def _pad_cast(x, shape, dtype):
    x = x.astype(dtype)
    if x.shape == tuple(shape):
        return x  # already aligned: skip the extra pad copy
    pads = [(0, t - s) for s, t in zip(x.shape, shape)]
    return jnp.pad(x, pads)  # zero pad: inert for the contractions


def custom_attention(queries, keys, weight, *, tq_max=512, tk_max=512):
    B, Q, Dq = queries.shape
    Bk, K, Dk = keys.shape
    assert Bk == B and weight.shape == (Dq, Dk)

    Dqp = _round_up(Dq, 128)
    Dkp = _round_up(Dk, 128)
    # TODO(synk): round Dkp/tk to multiples of 256 on v6e/v7x when Dk is large
    # (2x256^2 MXU) — skipped here since it would double wasted work at toy Dk.

    # Per-generation VMEM budget (v5e/v6e 128 MiB phys -> ~96 MiB; v7x 64 -> 48).
    try:
        vmem_cap = int(pltpu.get_tpu_info().vmem_capacity_bytes)
    except Exception:
        vmem_cap = 64 * 1024 * 1024
    vmem_limit = min(100 * 1024 * 1024, (vmem_cap * 3) // 4)
    budget = int(vmem_limit * 0.85)

    # Tile sizing under the budget: 2x q buffers, 1x W (single-buffered),
    # 3x keys buffers, 2x out buffers, 1x bf16 qw scratch.
    while True:
        tq, Qp = _derive_tile(Q, 8, tq_max)
        tk, Kp = _derive_tile(K, 128, tk_max)
        usage = (2 * tq * Dqp * 2 + Dqp * Dkp * 2 + 3 * tk * Dkp * 2
                 + 2 * tq * tk * 4 + tq * Dkp * 2)
        if usage <= budget or (tq_max <= 64 and tk_max <= 128):
            break
        if tq_max > 64:
            tq_max //= 2
        else:
            tk_max //= 2

    # v7x megacore: expose at least 2 units of work on the parallel grid axes.
    if B * (Qp // tq) < 2 and Qp >= 16:
        tq = _round_up(_cdiv(Qp, 2), 8)
        Qp = tq * _cdiv(_round_up(Q, 8), tq)

    # bf16 operands; f32 accumulation happens in-kernel on the MXU.
    qp = _pad_cast(queries, (B, Qp, Dqp), jnp.bfloat16)
    kp = _pad_cast(keys, (B, Kp, Dkp), jnp.bfloat16)
    wp = _pad_cast(weight, (Dqp, Dkp), jnp.bfloat16)

    grid = (B, Qp // tq, Kp // tk)  # K tiles innermost so the qw scratch is reused

    flops = 2 * B * Qp * Dqp * Dkp + 2 * B * Qp * Kp * Dkp
    bytes_accessed = qp.size * 2 + kp.size * 2 + wp.size * 2 + B * Qp * Kp * 4
    cost = pl.CostEstimate(flops=flops, transcendentals=0,
                           bytes_accessed=bytes_accessed)

    def build(with_pipeline_hints):
        w_kw = dict(pipeline_mode=pl.Buffered(1)) if with_pipeline_hints else {}
        k_kw = dict(pipeline_mode=pl.Buffered(3)) if with_pipeline_hints else {}
        return pl.pallas_call(
            _attention_scores_kernel,
            out_shape=jax.ShapeDtypeStruct((B, Qp, Kp), jnp.float32),
            grid_spec=pltpu.PrefetchScalarGridSpec(
                num_scalar_prefetch=0,
                grid=grid,
                in_specs=[
                    pl.BlockSpec((1, tq, Dqp), lambda b, qi, ki: (b, qi, 0)),
                    pl.BlockSpec((Dqp, Dkp), lambda b, qi, ki: (0, 0), **w_kw),
                    pl.BlockSpec((1, tk, Dkp), lambda b, qi, ki: (b, ki, 0), **k_kw),
                ],
                out_specs=pl.BlockSpec((1, tq, tk), lambda b, qi, ki: (b, qi, ki)),
                scratch_shapes=[pltpu.VMEM((tq, Dkp), jnp.bfloat16)],
            ),
            compiler_params=pltpu.CompilerParams(
                dimension_semantics=("parallel", "parallel", "arbitrary"),
                vmem_limit_bytes=vmem_limit,
            ),
            cost_estimate=cost,
        )

    try:
        out = jax.block_until_ready(build(True)(qp, wp, kp))
    except Exception:
        # Fallback: identical kernel without the pipeline-depth hints.
        out = jax.block_until_ready(build(False)(qp, wp, kp))

    if Qp == Q and Kp == K:
        return out  # skip the output slice copy when nothing was padded
    return out[:, :Q, :K]


if __name__ == "__main__":
    # Shapes from the reference module: keys (2,7,30), queries (2,5,20), W (20,30)
    B, Q, K = 2, 5, 7
    query_dim, key_dim = 20, 30

    root = jax.random.PRNGKey(0)
    kq, kk, kw = jax.random.split(root, 3)
    queries = jax.random.normal(kq, (B, Q, query_dim), dtype=jnp.float32)
    keys = jax.random.normal(kk, (B, K, key_dim), dtype=jnp.float32)
    weight = jax.random.normal(kw, (query_dim, key_dim), dtype=jnp.float32)

    scores = custom_attention(queries, keys, weight)
    jax.block_until_ready(scores)
    assert scores.shape == (B, Q, K)

    # Reference with the same numerics as the kernel (bf16 operands, f32 accum).
    qb = queries.astype(jnp.bfloat16)
    kb = keys.astype(jnp.bfloat16)
    wb = weight.astype(jnp.bfloat16)
    qw = jnp.einsum("bqd,dk->bqk", qb, wb,
                    preferred_element_type=jnp.float32).astype(jnp.bfloat16)
    ref_bf16 = jnp.einsum("bqk,bnk->bqn", qw, kb,
                          preferred_element_type=jnp.float32)
    assert jnp.allclose(scores, ref_bf16, atol=1e-2, rtol=1e-2)

    # Loose check against the full-precision f32 reference (bf16 quantization
    # of the operands is the only source of deviation).
    ref_f32 = jnp.einsum("bqd,dk,bnk->bqn", queries, weight, keys)
    assert jnp.allclose(scores, ref_f32, atol=0.5, rtol=5e-2)

    print("KERNEL_OK")
</pallas_src>

<mosaic_0001>
module attributes {stable_mosaic.version = 11 : i64} {
  func.func @_attention_scores_kernel(%arg0: i32, %arg1: i32, %arg2: i32, %arg3: memref<1x8x128xbf16, #tpu.memory_space<vmem>>, %arg4: memref<128x128xbf16, #tpu.memory_space<vmem>>, %arg5: memref<1x128x128xbf16, #tpu.memory_space<vmem>>, %arg6: memref<1x8x128xf32, #tpu.memory_space<vmem>>, %arg7: memref<8x128xbf16, #tpu.memory_space<vmem>>) attributes {dimension_semantics = [#tpu.dimension_semantics<parallel>, #tpu.dimension_semantics<parallel>, #tpu.dimension_semantics<arbitrary>], iteration_bounds = array<i64: 2, 1, 1>, scalar_prefetch = 0 : i64, scratch_operands = 1 : i64, tpu.core_type = #tpu.core_type<tc>, window_params = [{transform_indices = @transform_0, window_bounds = array<i64: 1, 8, 128>}, {pipeline_mode = #tpu.pipeline_mode<synchronous>, transform_indices = @transform_1, window_bounds = array<i64: 128, 128>}, {transform_indices = @transform_2, window_bounds = array<i64: 1, 128, 128>}, {transform_indices = @transform_3, window_bounds = array<i64: 1, 8, 128>}]} {
    %c0_i32 = arith.constant 0 : i32
    %0 = arith.cmpi eq, %arg2, %c0_i32 : i32
    %1 = arith.extui %0 : i1 to i32
    %c0_i32_0 = arith.constant 0 : i32
    %2 = arith.cmpi ne, %1, %c0_i32_0 : i32
    scf.if %2 {
      %c0_8 = arith.constant 0 : index
      %c0_9 = arith.constant 0 : index
      %c0_10 = arith.constant 0 : index
      %10 = vector.load %arg3[%c0_8, %c0_9, %c0_10] : memref<1x8x128xbf16, #tpu.memory_space<vmem>>, vector<1x8x128xbf16>
      %11 = vector.shape_cast %10 : vector<1x8x128xbf16> to vector<8x128xbf16>
      %c0_11 = arith.constant 0 : index
      %c0_12 = arith.constant 0 : index
      %12 = vector.load %arg4[%c0_11, %c0_12] : memref<128x128xbf16, #tpu.memory_space<vmem>>, vector<128x128xbf16>
      %cst_13 = arith.constant dense<0.000000e+00> : vector<8x128xf32>
      %13 = tpu.matmul %11, %12, %cst_13 {dimension_numbers = #tpu.dot_dimension_numbers<[1], [0], [0], [1], [0, 0, 1, 1], [], []>} : vector<8x128xbf16>, vector<128x128xbf16>, vector<8x128xf32> -> vector<8x128xf32>
      %14 = arith.truncf %13 : vector<8x128xf32> to vector<8x128xbf16>
      %c0_14 = arith.constant 0 : index
      %c0_15 = arith.constant 0 : index
      %15 = vector.load %arg7[%c0_14, %c0_15] : memref<8x128xbf16, #tpu.memory_space<vmem>>, vector<8x128xbf16>
      tpu.vector_store %arg7[%c0_14, %c0_15], %14 {strides = array<i32>} : memref<8x128xbf16, #tpu.memory_space<vmem>>, vector<8x128xbf16>,
    } else {
    }
    %c0 = arith.constant 0 : index
    %c0_1 = arith.constant 0 : index
    %3 = vector.load %arg7[%c0, %c0_1] : memref<8x128xbf16, #tpu.memory_space<vmem>>, vector<8x128xbf16>
    %c0_2 = arith.constant 0 : index
    %c0_3 = arith.constant 0 : index
    %c0_4 = arith.constant 0 : index
    %4 = vector.load %arg5[%c0_2, %c0_3, %c0_4] : memref<1x128x128xbf16, #tpu.memory_space<vmem>>, vector<1x128x128xbf16>
    %5 = vector.shape_cast %4 : vector<1x128x128xbf16> to vector<128x128xbf16>
    %cst = arith.constant dense<0.000000e+00> : vector<8x128xf32>
    %6 = tpu.matmul %3, %5, %cst {dimension_numbers = #tpu.dot_dimension_numbers<[1], [1], [0], [0], [0, 0, 1, 0], [], []>} : vector<8x128xbf16>, vector<128x128xbf16>, vector<8x128xf32> -> vector<8x128xf32>
    %c0_5 = arith.constant 0 : index
    %c0_6 = arith.constant 0 : index
    %c0_7 = arith.constant 0 : index
    %7 = vector.load %arg6[%c0_5, %c0_6, %c0_7] : memref<1x8x128xf32, #tpu.memory_space<vmem>>, vector<1x8x128xf32>
    %8 = vector.shape_cast %7 : vector<1x8x128xf32> to vector<8x128xf32>
    %9 = vector.shape_cast %6 : vector<8x128xf32> to vector<1x8x128xf32>
    tpu.vector_store %arg6[%c0_5, %c0_6, %c0_7], %9 {strides = array<i32>} : memref<1x8x128xf32, #tpu.memory_space<vmem>>, vector<1x8x128xf32>,
    return
  }
  func.func @transform_0(%arg0: i32, %arg1: i32, %arg2: i32) -> (i32, i32, i32) {
    %c0_i32 = arith.constant 0 : i32
    %c0_i32_0 = arith.constant 0 : i32
    return %arg0, %arg1, %c0_i32 : i32, i32, i32
  }
  func.func @transform_1(%arg0: i32, %arg1: i32, %arg2: i32) -> (i32, i32) {
    %c0_i32 = arith.constant 0 : i32
    %c0_i32_0 = arith.constant 0 : i32
    %c0_i32_1 = arith.constant 0 : i32
    return %c0_i32, %c0_i32_0 : i32, i32
  }
  func.func @transform_2(%arg0: i32, %arg1: i32, %arg2: i32) -> (i32, i32, i32) {
    %c0_i32 = arith.constant 0 : i32
    %c0_i32_0 = arith.constant 0 : i32
    return %arg0, %arg2, %c0_i32 : i32, i32, i32
  }
  func.func @transform_3(%arg0: i32, %arg1: i32, %arg2: i32) -> (i32, i32, i32) {
    %c0_i32 = arith.constant 0 : i32
    return %arg0, %arg1, %arg2 : i32, i32, i32
  }
}

</mosaic_0001>

<bundles_post_ra>
// kernel: tpu_custom_call.1
= control target key start
LH: loop header
LB: loop body
LE: loop exit
PB: predicated region body
PF: predicated region fallthrough
CT: control target
= control target key end

     0   :  { %8 = vsyncpa [#allocation4], 0  ;;  %s1216_s0 = inlined_call_operand.hbm [shape: bf16[2,8,128], index: 0, kind: input, shape index: {}]   ;;  %s1217_s1 = inlined_call_operand.hbm [shape: bf16[128,128], index: 1, kind: input, shape index: {}]   ;;  %s1218_s2 = inlined_call_operand.hbm [shape: bf16[2,128,128], index: 2, kind: input, shape index: {}]   ;;  %s1219_s3 = inlined_call_operand.hbm [shape: f32[2,8,128], index: 3, kind: output, shape index: {}]  }
   0x1   :  { %10 = vsyncpa [#allocation4 + $0x1], 0 }
   0x2   :  { %11 = vsyncpa [#allocation7], 0 }
   0x3   :  { %12 = vsyncpa [#allocation5], 0 }
   0x4   :  { %14 = vsyncpa [#allocation5 + $0x1], 0  ;;  %s1012_s12 = smov 0   ;;  %s1014_s13 = smov 0  }
   0x5   :  { %s1016_s14 = smov 0   ;;  %s1018_s15 = smov 0  }
   0x6   :  { %s1020_s16 = smov 0   ;;  %s1022_s17 = smov 0  }
   0x7 LB: > { %s39_s18 = sadd.s32 1, %s978_s16  ;;  %s48_s19 = sadd.s32 1, %s970_s14  ;;  %s982_s17 = sphi %s1022_s17, %s20_s17   ;;  %s978_s16 = sphi %s1020_s16, %s1237_s16   ;;  %s974_s15 = sphi %s1018_s15, %s1236_s15   ;;  %s970_s14 = sphi %s1016_s14, %s1235_s14   ;;  %s966_s13 = sphi %s1014_s13, %s1234_s13   ;;  %s962_s12 = sphi %s1012_s12, %s1233_s12  }
   0x8   : > { %p41_p0 = scmp.ge.s32.totalorder %s39_s18, 2  ;;  %p55_p1 = scmp.ne.s32.totalorder %s970_s14, %s966_s13 }
   0x9   : > { %p56_p2 = scmp.eq.s32.totalorder %s982_s17, 0  ;;  %p740_p5 = scmp.lt.s32.totalorder %s982_s17, 2 }
   0xa   : > { %s1239_s18 = smov (%p41_p0, %s39_s18), 0  ;;  %s177_s21 = sand.u32 1, %s982_s17  }
   0xb   : > { %p57_p4 = por %p56_p2, %p55_p1  ;;  %s43_s20 = ssub.s32 %s978_s16, %s1239_s18 }
   0xc   : > { %p46_p6 = scmp.eq.s32.totalorder %s43_s20, 0  ;;  %s179_s22 = sand.u32 1, %s970_s14  }
   0xd   : > { %s626_s23 = sshll.u32 %s978_s16, 6  ;;  %s625_s25 = sshll.u32 %s179_s22, 2 }
   0xe   : > { %s1060_s24 = scalar_select %p46_p6, %s970_s14, %s48_s19  }
   0xf   : > { %s187_s28 = scalar_lea.hbm %s1216_s0, %s626_s23  ;;  %p1065_p7 = pnand %p740_p5, %p57_p4 }
  0x10   : > { %s181_s30 = scalar_lea.vmem [#allocation3], %s625_s25  ;;  %s627_s5 = sshll.u32 %s179_s22, 6 }
  0x11   : > { %s189_s4 = sshll.u32 %s181_s30, 4  ;;  %s1069_s6 = scalar_lea.sflag [#allocation4], %s177_s21  ;;  %s190_s4 = int_to_ptr.vmem [resolvable:$true] %s189_s4 }
  0x12   : > { %p814_p8 = pneg %p1065_p7  ;;  %s825_s7 = scalar_lea.vmem %s190_s4, 64 }
  0x13   : > { %p826_p9 = scmp.ne.s32.totalorder %s190_s4, %s825_s7  ;;  %s984_s8 = smov [#allocation3]  }
  0x14   : > { %s830_s9 = sshll.u32 %s984_s8, 4  ;;  %s831_s9 = int_to_ptr.vmem [resolvable:$false] %s830_s9 }
  0x15   : > { %p828_p10 = pnand %p826_p9, %p814_p8  ;;  %s832_s10 = scalar_lea.vmem %s831_s9, 128 }
  0x16   : > { %p833_p12 = scmp.lt.s32.totalorder %s190_s4, %s831_s9  ;;  %p834_p13 = scmp.lt.s32.totalorder %s832_s10, %s825_s7 }
  0x17   : > { %p829_p11 = pneg %p828_p10 }
  0x18   : > { %p835_p0 = por %p834_p13, %p833_p12 }
  0x1a   : > { %p836_p2 = pnand %p835_p0, %p829_p11 }
  0x1c   : > { %839 = shalt.err (!%p836_p2)
}
  0x1d   : > { %731 = dma.hbm_to_vmem [thread:$0]  (!%p1065_p7), %s187_s28, 64, %s190_s4, %s1069_s6  }
  0x1e   : > { %s655_s11 = sshll.u32 %s978_s16, 10  ;;  %s200_s19 = scalar_lea.vmem [#allocation8], %s627_s5 }
  0x1f   : > { %s209_s20 = sshll.u32 %s200_s19, 4  ;;  %s1081_s21 = sadd.s32 4294967295, %s982_s17   ;;  %s210_s20 = int_to_ptr.vmem [resolvable:$true] %s209_s20 }
  0x20   : > { %s621_s22 = sadd.s32 4294967294, %s982_s17   ;;  %p61_p4 = scmp.ne.s32.totalorder %s966_s13, %s962_s12 }
  0x21   : > { %p1220_p5 = scmp.eq.s32.totalorder %s1081_s21, 0  ;;  %p138_p6 = scmp.eq.s32.totalorder %s1081_s21, 1 }
  0x22   : > { %p144_p9 = scmp.eq.s32.totalorder %s621_s22, 1  ;;  %p622_p11 = scmp.ge.s32.totalorder %s982_s17, 1 }
  0x23   : > { %p1090_p10 = por %p1220_p5, %p61_p4  ;;  %p1098_p12 = por %p138_p6, %p55_p1 }
  0x24   : > { %p1102_p13 = por %p144_p9, %p61_p4  ;;  %p151_p0 = scmp.lt.s32.totalorder %s982_s17, 3 }
  0x25   : > { %s1224_s25 = scalar_select %p1098_p12, 1, 0 }
  0x26   : > { %s1225_s26 = scalar_select %p1102_p13, 1, 0 }
  0x27   : > { %p1107_p2 = pnand %p622_p11, %p151_p0  ;;  %s985_s28 = smov [#allocation6]  }
  0x28   : > { %s163_s30 = sshll.u32 %s985_s28, 4  ;;  %s208_s7 = scalar_lea.hbm %s1218_s2, %s655_s11  ;;  %s164_s30 = int_to_ptr.vmem [resolvable:$true] %s163_s30 }
  0x29   : > { %p724_p3 = pneg %p1107_p2  ;;  %s853_s8 = scalar_lea.vmem %s210_s20, 1024 }
  0x2a   : > { %p854_p1 = scmp.ne.s32.totalorder %s210_s20, %s853_s8  ;;  %s986_s9 = smov [#allocation8]  }
  0x2b   : > { %s858_s10 = sshll.u32 %s986_s9, 4  ;;  %s859_s10 = int_to_ptr.vmem [resolvable:$false] %s858_s10 }
  0x2c   : > { %p856_p4 = pnand %p854_p1, %p814_p8  ;;  %s860_s19 = scalar_lea.vmem %s859_s10, 2048 }
  0x2d   : > { %p861_p9 = scmp.lt.s32.totalorder %s210_s20, %s859_s10  ;;  %p862_p11 = scmp.lt.s32.totalorder %s860_s19, %s853_s8 }
  0x2e   : > { %p857_p6 = pneg %p856_p4 }
  0x2f   : > { %p863_p0 = por %p862_p11, %p861_p9 }
  0x31   : > { %p864_p5 = pnand %p863_p0, %p857_p6 }
  0x33   : > { %867 = shalt.err (!%p864_p5)
}
  0x34   : > { %s987_s22 = smov 64   ;;  %s988_s11 = smov 4  }
  0x35   : > { %734 = dma.hbm_to_vmem [thread:$0]  (!%p1065_p7), %s208_s7, 1024, %s210_s20, %s1069_s6, %s987_s22, %s987_s22, %s988_s11  }
  0x36   : > { %p1227_p8 = scmp.eq.s32.totalorder %s1081_s21, 0  ;;  %s879_s28 = scalar_lea.vmem %s164_s30, 1024 }
  0x37   : > { %p880_p13 = scmp.ne.s32.totalorder %s164_s30, %s879_s28  ;;  %p887_p6 = scmp.lt.s32.totalorder %s164_s30, %s164_s30 }
  0x38   : > { %p725_p1 = pnand %p724_p3, %p1227_p8  ;;  %p888_p5 = scmp.lt.s32.totalorder %s879_s28, %s879_s28 }
  0x3a   : > { %p870_p4 = pneg %p725_p1  ;;  %p889_p11 = por %p888_p5, %p887_p6 }
  0x3c   : > { %p882_p12 = pnand %p880_p13, %p870_p4 }
  0x3e   : > { %p883_p9 = pneg %p882_p12 }
  0x40   : > { %p890_p0 = pnand %p889_p11, %p883_p9 }
  0x42   : > { %893 = shalt.err (!%p890_p0)
}
  0x43   : > { %727 = dma.hbm_to_vmem [thread:$0]  (!%p725_p1), %s1217_s1, 1024, %s164_s30, [#allocation7], %s987_s22, %s987_s22, %s988_s11  }
  0x44   : > { %221 = sbr.rel (%p1107_p2) target bundleno = 526 (0x20e), region = 32  ;;  %s223_s29 = sand.u32 (!%p1107_p2), 1, %s1081_s21  }
  0x45   : > { %s1134_s6 = sand.u32 (!%p1107_p2), 1, %s966_s13   ;;  %s224_s7 = scalar_lea.sflag (!%p1107_p2), [#allocation4], %s223_s29 }
  0x46   : > { %s631_s20 = sshll.u32 (!%p1107_p2), %s1134_s6, 2 }
  0x47   : > { %s1137_s8 = scalar_lea.vmem (!%p1107_p2), [#allocation3], %s631_s20 }
  0x49   : > { %945 = dma.done.wait (%p1090_p10), %s224_s7, 64  }
  0x4a   : > { %947 = vsyncadd (%p1090_p10), %s224_s7, 4294967232  ;;  %p1228_p3 = scmp.eq.s32.totalorder %s1081_s21, 0 }
  0x4c   : > { %949 = dma.done.wait (%p1228_p3), [#allocation7], 1024   ;;  %p1229_p7 = pmov %p1228_p3 }
  0x4d   : > { %s633_s27 = sshll.u32 %s1134_s6, 6 }
  0x4e   : > { %951 = vsyncadd (%p1229_p7), [#allocation7], 4294966272  ;;  %s1148_s30 = scalar_lea.vmem [#allocation8], %s633_s27 }
  0x4f   : > { %953 = dma.done.wait (%p1090_p10), %s224_s7, 1024  }
  0x50   : > { %955 = vsyncadd (%p1090_p10), %s224_s7, 4294966272  ;;  %v989_v0 = vmov 0.0   ;;  %vm990_vm0 = vmmov 0   ;;  %v796_v1 = vld [vmem:[#allocation6 + $0x38] sm:$0xff]   ;;  %v797_v2 = vld [vmem:[#allocation6 + $0x30] sm:$0xff]   ;;  %s634_s21 = sshll.u32 %s1134_s6, 3 }
  0x51   : > { %674 = vmatprep.subr.bf16.mxu0 %v989_v0  ;;  %690 = vmatprep.mubr.msk.bf16.mxu0 %vm990_vm0, %v989_v0  ;;  %v798_v3 = vld [vmem:[#allocation6 + $0x28] sm:$0xff]   ;;  %v804_v4 = vld [vmem:[%s1148_s30 + $0x38] sm:$0xff]   ;;  %v799_v5 = vld [vmem:[#allocation6 + $0x20] sm:$0xff]   ;;  %s267_s23 = scalar_lea.vmem [#allocation9], %s634_s21  ;;  %s652_s10 = sshll.u32 %s974_s15, 7 }
  0x52   : > { %694 = vmatprep.subr.bf16.mxu1 %v989_v0  ;;  %710 = vmatprep.mubr.msk.bf16.mxu1 %vm990_vm0, %v989_v0  ;;  %v800_v6 = vld [vmem:[#allocation6 + $0x18] sm:$0xff]   ;;  %v805_v7 = vld [vmem:[%s1148_s30 + $0x30] sm:$0xff]   ;;  %v802_v9 = vld [vmem:[#allocation6 + $0x8] sm:$0xff]   ;;  %s503_s9 = sshll.u32 %s267_s23, 4  ;;  %s1170_s11 = scalar_lea.hbm %s1219_s3, %s652_s10  ;;  %s1165_s9 = int_to_ptr.vmem [resolvable:$true] %s503_s9 }
  0x53   : > { %675 = vmatpush3.bf16.msra.mxu0 %v796_v1  ;;  %695 = vmatpush3.bf16.xpose.msra.mxu1 %v804_v4  ;;  %v801_v8 = vld [vmem:[#allocation6 + $0x10] sm:$0xff]   ;;  %v806_v10 = vld [vmem:[%s1148_s30 + $0x28] sm:$0xff]   ;;  %v803_v11 = vld [vmem:[#allocation6] sm:$0xff]   ;;  %s488_s28 = scalar_lea.sflag [#allocation5], %s1134_s6  ;;  %s894_s4 = scalar_lea.vmem %s1165_s9, 128 }
  0x54   : > { %676 = vmatprep.subr.bf16.mxu0 %v989_v0  ;;  %696 = vmatprep.subr.bf16.mxu1 %v989_v0  ;;  %v274_v12 = vld [vmem:[%s1137_s8] sm:$0xf]  ;;  %v807_v13 = vld [vmem:[%s1148_s30 + $0x20] sm:$0xff]   ;;  %v809_v15 = vld [vmem:[%s1148_s30 + $0x10] sm:$0xff]   ;;  %p895_p10 = scmp.ne.s32.totalorder %s1165_s9, %s894_s4  ;;  %p1230_p12 = scmp.ne.s32.totalorder %s1224_s25, 0 }
  0x55   : > { %v808_v14 = vld [vmem:[%s1148_s30 + $0x18] sm:$0xff]   ;;  %v810_v16 = vld [vmem:[%s1148_s30 + $0x8] sm:$0xff]   ;;  %v811_v17 = vld [vmem:[%s1148_s30] sm:$0xff]   ;;  %s991_s15 = smov [#allocation9]  }
  0x56   : > { %p896_p13 = pnand %p895_p10, %p1230_p12  ;;  %s898_s5 = sshll.u32 %s991_s15, 4  ;;  %s899_s5 = int_to_ptr.vmem [resolvable:$false] %s898_s5 }
  0x57   : > { %677 = vmatpush3.bf16.msra.mxu0 %v797_v2  ;;  %s900_s29 = scalar_lea.vmem %s899_s5, 256  ;;  %p901_p8 = scmp.lt.s32.totalorder %s1165_s9, %s899_s5 }
  0x58   : > { %678 = vmatprep.subr.bf16.mxu0 %v989_v0  ;;  %p897_p2 = pneg %p896_p13  ;;  %p902_p1 = scmp.lt.s32.totalorder %s900_s29, %s894_s4 }
  0x5a   : > { %p903_p4 = por %p902_p1, %p901_p8 }
  0x5b   : > { %679 = vmatpush3.bf16.msra.mxu0 %v798_v3  ;;  %697 = vmatpush3.bf16.xpose.msra.mxu1 %v805_v7 }
  0x5c   : > { %680 = vmatprep.subr.bf16.mxu0 %v989_v0  ;;  %698 = vmatprep.subr.bf16.mxu1 %v989_v0  ;;  %p904_p9 = pnand %p903_p4, %p897_p2 }
  0x5f   : > { %681 = vmatpush3.bf16.msra.mxu0 %v799_v5 }
  0x60   : > { %682 = vmatprep.subr.bf16.mxu0 %v989_v0 }
  0x63   : > { %683 = vmatpush3.bf16.msra.mxu0 %v800_v6  ;;  %699 = vmatpush3.bf16.xpose.msra.mxu1 %v806_v10 }
  0x64   : > { %684 = vmatprep.subr.bf16.mxu0 %v989_v0  ;;  %700 = vmatprep.subr.bf16.mxu1 %v989_v0 }
  0x67   : > { %685 = vmatpush3.bf16.msra.mxu0 %v801_v8 }
  0x68   : > { %686 = vmatprep.subr.bf16.mxu0 %v989_v0 }
  0x6b   : > { %687 = vmatpush3.bf16.msra.mxu0 %v802_v9  ;;  %701 = vmatpush3.bf16.xpose.msra.mxu1 %v807_v13 }
  0x6c   : > { %688 = vmatprep.subr.bf16.mxu0 %v989_v0  ;;  %702 = vmatprep.subr.bf16.mxu1 %v989_v0 }
  0x6f   : > { %689 = vmatpush3.bf16.msra.mxu0 %v803_v11 }
  0x72   : > { %691 = vmatmul.mubr.bf16.vlgmr.msra.gmra.mxu0 %v274_v12 }
  0x73   : > { %703 = vmatpush3.bf16.xpose.msra.mxu1 %v808_v14 }
  0x74   : > { %704 = vmatprep.subr.bf16.mxu1 %v989_v0 }
  0x7b   : > { %705 = vmatpush3.bf16.xpose.msra.mxu1 %v809_v15 }
  0x7c   : > { %706 = vmatprep.subr.bf16.mxu1 %v989_v0 }
  0x83   : > { %707 = vmatpush3.bf16.xpose.msra.mxu1 %v810_v16 }
  0x84   : > { %708 = vmatprep.subr.bf16.mxu1 %v989_v0 }
  0x8b   : > { %709 = vmatpush3.bf16.xpose.msra.mxu1 %v811_v17 }
 0x132   : > { %v373_v18 = vpop.f32.mrf.mxu0 }
 0x133   : > { %v379_v19 = vpack.c.bf16 %v373_v18, %v373_v18 }
 0x134   : > { %v692_v20 = vpop.f32.mrf.mxu0 }
 0x135   : > { %380 = vst [vmem:[#allocation2] sm:$0xf] %v379_v19 }
 0x136   : > { %v376_v21 = vpop.f32.mrf.mxu0 }
 0x138   : > { %v693_v22 = vpop.f32.mrf.mxu0 }
 0x13c   : > { %v381_v23 = vld [vmem:[#allocation2] sm:$0xf] }
 0x13d   : > { %711 = vmatmul.mubr.bf16.vlgmr.msra.gmra.mxu1 %v381_v23 }
 0x1fd   : > { %v480_v24 = vpop.f32.mrf.mxu1 }
 0x1fe   : > { %486 = vst [vmem:[%s267_s23] sm:$0xff] %v480_v24 }
 0x1ff   : > { %v712_v25 = vpop.f32.mrf.mxu1 }
 0x200   : > { %907 = shalt.err (!%p904_p9)
}
 0x201   : > { %s908_s20 = scalar_lea.hbm %s1170_s11, 128  ;;  %s912_s8 = scalar_lea.hbm %s1219_s3, 256 }
 0x202   : > { %p909_p6 = scmp.ne.s32.totalorder %s1170_s11, %s908_s20  ;;  %p913_p0 = scmp.lt.s32.totalorder %s1170_s11, %s1219_s3 }
 0x203   : > { %p914_p3 = scmp.lt.s32.totalorder %s912_s8, %s908_s20 }
 0x204   : > { %p910_p5 = pnand %p909_p6, %p1230_p12 }
 0x205   : > { %p915_p7 = por %p914_p3, %p913_p0 }
 0x206   : > { %p911_p11 = pneg %p910_p5 }
 0x208   : > { %p916_p10 = pnand %p915_p7, %p911_p11 }
 0x20a   : > { %919 = shalt.err (!%p916_p10)
}
 0x20b   : > { %722 = dma.vmem_to_hbm [thread:$0]  (%p1230_p12), %s1165_s9, 128, %s1170_s11, %s488_s28   ;;  %v483_v26 = vpop.f32.mrf.mxu1 }
 0x20d   : > { %v713_v27 = vpop.f32.mrf.mxu1 }
 0x20e PF: > { %s515_s21 = sand.u32 1, %s962_s12   ;;  %p1231_p13 = scmp.ne.s32.totalorder %s1225_s26, 0 }
 0x20f   : > { %p1232_p2 = scmp.ge.s32.totalorder %s982_s17, 2  ;;  %s516_s23 = scalar_lea.sflag [#allocation5], %s515_s21 }
 0x211   : > { %p736_p8 = pnand %p1232_p2, %p1231_p13 }
 0x213   : > { %p737_p1 = pneg %p736_p8 }
 0x215   : > { %957 = dma.done.wait (%p737_p1), %s516_s23, 128  }
 0x216   : > { %959 = vsyncadd (%p737_p1), %s516_s23, 4294967168  ;;  %s20_s17 = sadd.s32 1, %s982_s17   ;;  %s1233_s12 = smov %s966_s13 }
 0x217   : > { %p17_p4 = scmp.ge.s32.totalorder %s20_s17, 4   ;;  %s1234_s13 = smov %s970_s14 }
 0x218   : > { %s1235_s14 = smov %s1060_s24  ;;  %s1236_s15 = smov %s978_s16 }
 0x219   : > { %s1237_s16 = smov %s1239_s18  ;;  %19 = sbr.rel (!%p17_p4) target bundleno = 7 (0x7), region = 96 }
 0x21e   :  { %521 = vsyncpa [#allocation4], 1 }
 0x21f   :  { %523 = vsyncpa [#allocation4 + $0x1], 1 }
 0x220   :  { %524 = vsyncpa [#allocation7], 1 }
 0x221   :  { %525 = vsyncpa [#allocation5], 1 }
 0x222   :  { %527 = vsyncpa [#allocation5 + $0x1], 1 }

</bundles_post_ra>
